<compile_context>
chip_gen: v5e
topology: v5e:2x2
jax: 0.10.0
libtpu: 0.0.40
codegen_flags: <defaults>
</compile_context>

<pallas_src>
import functools

import jax
import jax.numpy as jnp
from jax.experimental import pallas as pl
from jax.experimental.pallas import tpu as pltpu


def _fovea_kernel(scale_ref, x_ref, o_ref, *, hw, hw_padded):
    # x_ref: (block_rows, hw_padded) tile in VMEM; scale_ref: (1, 1) in SMEM.
    x = x_ref[...].astype(jnp.float32)
    s = scale_ref[0, 0]
    z = x * s                                        # smooth scaling (1.0 if smooth=False)

    if hw_padded != hw:
        # Mask padded lanes so they contribute nothing to the softmax.
        lane = jax.lax.broadcasted_iota(jnp.int32, z.shape, dimension=1)
        z = jnp.where(lane < hw, z, -jnp.inf)

    m = jnp.max(z, axis=-1, keepdims=True)           # numerically-stable softmax
    e = jnp.exp(z - m)
    denom = jnp.sum(e, axis=-1, keepdims=True)
    inv = pl.reciprocal(denom, approx=False)         # EUP reciprocal, exact
    # mask * original (unscaled) x; padded lanes: e == 0 and x == 0 -> 0.
    o_ref[...] = ((e * x) * inv).astype(o_ref.dtype)


def fovea_forward(x, smooth=False, smooth_param=None, tile_budget_bytes=None):
    """x: [b, c, h, w] (NCHW).  Returns [b, c, h, w]."""
    b, c, h, w = x.shape
    hw = h * w
    rows = b * c
    x2d = x.reshape(rows, hw)

    dtype_bytes = jnp.dtype(x.dtype).itemsize
    packing = max(8, 8 * (4 // dtype_bytes))         # sublane packing: 8 f32, 16 bf16, ...

    # Pad the lane (spatial) axis to a multiple of 128 for unmasked full-width stores.
    hw_padded = ((hw + 127) // 128) * 128
    if hw_padded != hw:
        x2d = jnp.pad(x2d, ((0, 0), (0, hw_padded - hw)))

    if smooth:
        scale = jnp.asarray(smooth_param, dtype=jnp.float32).reshape(1, 1)
    else:
        scale = jnp.ones((1, 1), dtype=jnp.float32)

    # Per-generation tile budget: ~1/16 of VMEM per tile (v7x has 64 MiB, v5e/v6e 128 MiB).
    try:
        vmem_cap = int(pltpu.get_tpu_info().vmem_capacity_bytes)
    except Exception:
        vmem_cap = 64 * 1024 * 1024                  # conservative default (v7x)
    if tile_budget_bytes is None:
        tile_budget_bytes = max(512 * 1024, vmem_cap // 16)

    # TODO(synk): for very large h*w (multi-MiB rows) add a second "arbitrary"
    # grid axis over hw with an online-softmax (running max/sum scratch) instead
    # of requiring the whole spatial row in one tile.
    row_bytes = hw_padded * dtype_bytes
    br = tile_budget_bytes // row_bytes
    if br >= rows or rows <= packing:
        block_rows = rows                            # full dim: always a legal block
    else:
        block_rows = max(packing, (br // packing) * packing)

    # Keep >= 2 grid steps (when possible) so the parallel axis can shard over
    # v7x's two TensorCores; harmless on single-TC v5e/v6e (per-step overhead ~0.35us).
    if rows > packing and pl.cdiv(rows, block_rows) < 2:
        half = (rows + 1) // 2
        block_rows = max(packing, ((half + packing - 1) // packing) * packing)

    grid = (pl.cdiv(rows, block_rows),)

    # VMEM budget: double-buffered in + out tiles plus f32 intermediates + slack.
    tile_bytes = block_rows * hw_padded * dtype_bytes
    tile_f32_bytes = block_rows * hw_padded * 4
    needed = 4 * tile_bytes + 4 * tile_f32_bytes + (1 << 20)
    vmem_limit = int(min(max(needed, 32 << 20), max(vmem_cap - (8 << 20), 32 << 20)))

    kernel = functools.partial(_fovea_kernel, hw=hw, hw_padded=hw_padded)

    out2d = pl.pallas_call(
        kernel,
        out_shape=jax.ShapeDtypeStruct((rows, hw_padded), x.dtype),
        grid_spec=pl.GridSpec(
            grid=grid,
            in_specs=[
                pl.BlockSpec(memory_space=pltpu.SMEM),                    # scale scalar
                pl.BlockSpec((block_rows, hw_padded), lambda i: (i, 0)),  # x row tile
            ],
            out_specs=pl.BlockSpec((block_rows, hw_padded), lambda i: (i, 0)),
        ),
        compiler_params=pltpu.CompilerParams(
            dimension_semantics=("parallel",),
            vmem_limit_bytes=vmem_limit,
        ),
    )(scale, x2d)

    if hw_padded != hw:
        out2d = out2d[:, :hw]
    return out2d.reshape(b, c, h, w)


def _fovea_ref(x, smooth=False, smooth_param=None):
    b, c, h, w = x.shape
    x2 = x.reshape(b, c, h * w).astype(jnp.float32)
    z = x2 * (jnp.asarray(smooth_param, jnp.float32) if smooth else 1.0)
    mask = jax.nn.softmax(z, axis=-1)
    return (mask * x2).reshape(b, c, h, w).astype(x.dtype)


if __name__ == "__main__":
    keys = jax.random.split(jax.random.PRNGKey(0), 3)

    # --- Case 1: f32, hw multiple of 128 (2, 4, 16, 16) -------------------
    b, c, h, w = 2, 4, 16, 16
    x = jax.random.normal(keys[0], (b, c, h, w), dtype=jnp.float32)

    # Deterministic parameter init matching the module: smooth = zeros(1) + 10.0
    smooth_param = jnp.zeros((1,), jnp.float32) + 10.0

    out = fovea_forward(x, smooth=False)
    jax.block_until_ready(out)
    ref = _fovea_ref(x, smooth=False)
    assert jnp.allclose(out, ref, atol=1e-5, rtol=1e-5), "mismatch (smooth=False)"

    out_s = fovea_forward(x, smooth=True, smooth_param=smooth_param)
    jax.block_until_ready(out_s)
    ref_s = _fovea_ref(x, smooth=True, smooth_param=smooth_param)
    assert jnp.allclose(out_s, ref_s, atol=1e-5, rtol=1e-5), "mismatch (smooth=True)"

    # --- Case 2: hw NOT a multiple of 128 (lane-padding path), 2x3x14x14 ---
    x2 = jax.random.normal(keys[1], (2, 3, 14, 14), dtype=jnp.float32)
    out2 = fovea_forward(x2, smooth=False)
    jax.block_until_ready(out2)
    ref2 = _fovea_ref(x2, smooth=False)
    assert jnp.allclose(out2, ref2, atol=1e-5, rtol=1e-5), "mismatch (padded hw)"

    # --- Case 3: bf16 input ------------------------------------------------
    x3 = x.astype(jnp.bfloat16)
    out3 = fovea_forward(x3, smooth=False)
    jax.block_until_ready(out3)
    ref3 = _fovea_ref(x3, smooth=False)
    assert jnp.allclose(out3.astype(jnp.float32), ref3.astype(jnp.float32),
                        atol=1e-2, rtol=1e-2), "mismatch (bf16)"

    print("KERNEL_OK")
</pallas_src>

<mosaic_0001>
module attributes {stable_mosaic.version = 11 : i64} {
  func.func @_fovea_kernel(%arg0: i32, %arg1: memref<1x1xf32, #tpu.memory_space<smem>>, %arg2: memref<8x256xf32, #tpu.memory_space<vmem>>, %arg3: memref<8x256xf32, #tpu.memory_space<vmem>>) attributes {dimension_semantics = [#tpu.dimension_semantics<parallel>], iteration_bounds = array<i64: 1>, scalar_prefetch = 0 : i64, scratch_operands = 0 : i64, tpu.core_type = #tpu.core_type<tc>, window_params = [{transform_indices = @transform_0, window_bounds = array<i64: 1, 1>}, {transform_indices = @transform_1, window_bounds = array<i64: 8, 256>}, {transform_indices = @transform_2, window_bounds = array<i64: 8, 256>}]} {
    %c0 = arith.constant 0 : index
    %c0_0 = arith.constant 0 : index
    %0 = vector.load %arg2[%c0, %c0_0] : memref<8x256xf32, #tpu.memory_space<vmem>>, vector<8x256xf32>
    %c0_1 = arith.constant 0 : index
    %c0_2 = arith.constant 0 : index
    %1 = memref.load %arg1[%c0_1, %c0_2] : memref<1x1xf32, #tpu.memory_space<smem>>
    %2 = vector.broadcast %1 : f32 to vector<8x256xf32>
    %3 = arith.mulf %0, %2 : vector<8x256xf32>
    %cst = arith.constant dense<0xFF800000> : vector<8xf32>
    %4 = vector.multi_reduction <maximumf>, %3, %cst [1] : vector<8x256xf32> to vector<8xf32>
    %5 = vector.shape_cast %4 : vector<8xf32> to vector<8x1xf32>
    %6 = vector.broadcast %5 : vector<8x1xf32> to vector<8x256xf32>
    %7 = arith.subf %3, %6 : vector<8x256xf32>
    %8 = math.exp %7 : vector<8x256xf32>
    %cst_3 = arith.constant dense<0.000000e+00> : vector<8xf32>
    %9 = vector.multi_reduction <add>, %8, %cst_3 [1] : vector<8x256xf32> to vector<8xf32>
    %10 = vector.shape_cast %9 : vector<8xf32> to vector<8x1xf32>
    %11 = tpu.reciprocal %10 : vector<8x1xf32> -> vector<8x1xf32>
    %12 = arith.mulf %8, %0 : vector<8x256xf32>
    %13 = vector.broadcast %11 : vector<8x1xf32> to vector<8x256xf32>
    %14 = arith.mulf %12, %13 : vector<8x256xf32>
    %c0_4 = arith.constant 0 : index
    %c0_5 = arith.constant 0 : index
    %15 = vector.load %arg3[%c0_4, %c0_5] : memref<8x256xf32, #tpu.memory_space<vmem>>, vector<8x256xf32>
    tpu.vector_store %arg3[%c0_4, %c0_5], %14 {strides = array<i32>} : memref<8x256xf32, #tpu.memory_space<vmem>>, vector<8x256xf32>,
    return
  }
  func.func @transform_0(%arg0: i32) -> (i32, i32) {
    %c0_i32 = arith.constant 0 : i32
    %c0_i32_0 = arith.constant 0 : i32
    %c0_i32_1 = arith.constant 0 : i32
    return %c0_i32, %c0_i32_0 : i32, i32
  }
  func.func @transform_1(%arg0: i32) -> (i32, i32) {
    %c0_i32 = arith.constant 0 : i32
    %c0_i32_0 = arith.constant 0 : i32
    return %arg0, %c0_i32 : i32, i32
  }
  func.func @transform_2(%arg0: i32) -> (i32, i32) {
    %c0_i32 = arith.constant 0 : i32
    %c0_i32_0 = arith.constant 0 : i32
    return %arg0, %c0_i32 : i32, i32
  }
}

</mosaic_0001>

<bundles_post_ra>
// kernel: tpu_custom_call.1
= control target key start
LH: loop header
LB: loop body
LE: loop exit
PB: predicated region body
PF: predicated region fallthrough
CT: control target
= control target key end

     0   :  { %8 = vsyncpa [#allocation4], 0  ;;  %s168_s0 = inlined_call_operand.<no memory space> [shape: f32[1,1], index: 0, kind: input, shape index: {}]   ;;  %s169_s1 = inlined_call_operand.hbm [shape: f32[8,256], index: 1, kind: input, shape index: {}]   ;;  %s170_s2 = inlined_call_operand.hbm [shape: f32[8,256], index: 2, kind: output, shape index: {}]  }
   0x1   :  { %9 = vsyncpa [#allocation5], 0  ;;  %s17_s11 = sshll.u32 %s169_s1, 4  ;;  %s142_s12 = smov [#allocation3]   ;;  %s18_s11 = int_to_ptr.hbm [resolvable:$true] %s17_s11 }
   0x2   :  { %s19_s13 = sshll.u32 %s142_s12, 4  ;;  %s20_s13 = int_to_ptr.vmem [resolvable:$true] %s19_s13 }
   0x3   :  { %22 = dma.hbm_to_vmem [thread:$0]  %s18_s11, 256, %s20_s13, [#allocation4]  }
   0x4   :  { %138 = dma.done.wait [#allocation4], 256  }
   0x5   :  { %139 = vsyncadd [#allocation4], 4294967040  ;;  %v30_v0 = vstv %s168_s0  ;;  %v27_v1 = vld [vmem:[#allocation3] sm:$0xff]  ;;  %v28_v2 = vld [vmem:[#allocation3 + $0x8] sm:$0xff]  ;;  %s143_s0 = smov [#allocation6]   ;;  %s72_s18 = sshll.u32 %s170_s2, 4  ;;  %s73_s18 = int_to_ptr.hbm [resolvable:$true] %s72_s18 }
   0x6   :  { %v31_v3 = vmul.f32 %v30_v0, %v27_v1  ;;  %v32_v4 = vmul.f32 %v30_v0, %v28_v2  ;;  %s70_s1 = sshll.u32 %s143_s0, 4  ;;  %s71_s1 = int_to_ptr.vmem [resolvable:$true] %s70_s1 }
   0x8   :  { %v33_v5 = vmax.f32 %v31_v3, %v32_v4 }
   0xa   :  { %34 = vmax.xlane.f32.xlu0 %v33_v5 }
  0x7d   :  { %v35_v6 = vpop.xlane.xlu0 %34 }
  0x7e   :  { %v36_v7 = vsub.f32 %v31_v3, %v35_v6  ;;  %v37_v8 = vsub.f32 %v32_v4, %v35_v6 }
  0x80   :  { %v38_v9 = vmul.f32 1.442695, %v36_v7  ;;  %v40_v10 = vmul.f32 1.442695, %v37_v8 }
  0x82   :  { %84 = vpow2.f32 %v38_v9 }
  0x83   :  { %86 = vpow2.f32 %v40_v10 }
  0x88   :  { %v85_v11 = vpop.eup %84 }
  0x89   :  { %v87_v12 = vpop.eup %86  ;;  %v59_v24 = vmul.f32 %v85_v11, %v27_v1 }
  0x8a   :  { %v42_v13 = vadd.f32 %v87_v12, %v85_v11  ;;  %v60_v25 = vmul.f32 %v87_v12, %v28_v2 }
  0x8c   :  { %43 = vadd.xlane.f32.xlu0 %v42_v13 }
  0xff   :  { %v44_v14 = vpop.xlane.xlu0 %43 }
 0x100   :  { %88 = vrcp.f32 %v44_v14  ;;  %v56_v18 = vand.u32 2147483648, %v44_v14  ;;  %v54_v20 = vand.u32 2147483647, %v44_v14  ;;  %vm50_vm1 = vweird.f32 %v44_v14 }
 0x102   :  { %v57_v22 = vor.u32 1.1754944e-38, %v56_v18  ;;  %vm55_vm3 = vcmp.eq.f32.partialorder %v54_v20, 8.507059e+37 }
 0x106   :  { %v89_v15 = vpop.eup %88 }
 0x107   :  { %v46_v16 = vmul.f32 %v89_v15, %v44_v14  ;;  %vm51_vm0 = vweird.f32 %v89_v15 }
 0x108   :  { %vm52_vm2 = vmor %vm50_vm1, %vm51_vm0 }
 0x109   :  { %v47_v17 = vsub.f32 1.0, %v46_v16 }
 0x10b   :  { %v48_v19 = vmul.f32 %v89_v15, %v47_v17 }
 0x10d   :  { %v49_v21 = vadd.f32 %v89_v15, %v48_v19 }
 0x10f   :  { %v53_v23 = vsel %vm52_vm2, %v89_v15, %v49_v21 }
 0x110   :  { %v58_v26 = vsel %vm55_vm3, %v57_v22, %v53_v23 }
 0x111   :  { %v61_v27 = vmul.f32 %v59_v24, %v58_v26  ;;  %v62_v28 = vmul.f32 %v60_v25, %v58_v26 }
 0x113   :  { %63 = vst [vmem:[#allocation6] sm:$0xff] %v61_v27 }
 0x114   :  { %64 = vst [vmem:[#allocation6 + $0x8] sm:$0xff] %v62_v28 }
 0x115   :  { %75 = dma.vmem_to_hbm [thread:$0]  %s71_s1, 256, %s73_s18, [#allocation5]  }
 0x116   :  { %140 = dma.done.wait [#allocation5], 256  }
 0x117   :  { %141 = vsyncadd [#allocation5], 4294967040 }
 0x118   :  { %80 = vsyncpa [#allocation4], 1 }
 0x119   :  { %81 = vsyncpa [#allocation5], 1 }

</bundles_post_ra>
